<compile_context>
chip_gen: v5e
topology: v5e:2x2
jax: 0.10.0
libtpu: 0.0.40
codegen_flags: <defaults>
</compile_context>

<pallas_src>
import math
import functools

import jax
import jax.numpy as jnp
from jax.experimental import pallas as pl
from jax.experimental.pallas import tpu as pltpu


def _round_up(x: int, m: int) -> int:
    return ((x + m - 1) // m) * m


def _choose_tile_tokens(n_tokens: int, vocab: int, d_model: int) -> int:
    """Pick a token tile size: target ~512 tokens/step, sublane-aligned (x8),
    capped so per-buffer f32 tiles ((T, d_model) output, (T, vocab) one-hot)
    each stay around <= 4 MiB."""
    budget = 4 << 20  # bytes per buffer
    cap_out = max(8, (budget // (4 * d_model)) // 8 * 8)
    cap_onehot = max(8, (budget // (4 * vocab)) // 8 * 8)
    t = min(512, cap_out, cap_onehot, _round_up(n_tokens, 8))
    return max(8, t)


def _embed_kernel(ids_ref, emb_ref, out_ref, *, scale):
    # ids_ref: (T, 1)       int32 token ids for this tile (VMEM)
    # emb_ref: (vocab, D)   full embedding table, resident in VMEM
    # out_ref: (T, D)       float32 output tile
    t, _ = ids_ref.shape
    vocab = emb_ref.shape[0]

    ids = ids_ref[...]                                                # (T, 1)
    vocab_iota = jax.lax.broadcasted_iota(jnp.int32, (t, vocab), 1)   # (T, vocab)
    onehot = jnp.where(ids == vocab_iota, 1.0, 0.0).astype(emb_ref.dtype)

    # Row gather as one-hot matmul on the MXU.  HIGHEST precision keeps the
    # gathered f32 values exact (products are x * 1.0).
    rows = jnp.dot(
        onehot,
        emb_ref[...],
        precision=jax.lax.Precision.HIGHEST,
        preferred_element_type=jnp.float32,
    )                                                                  # (T, D)

    out_ref[...] = rows * scale  # fused sqrt(d_model) scaling


def input_embeddings(x, embedding_table, *, tile_tokens=None):
    """x: (B, S) int token ids; embedding_table: (vocab, d_model) float.

    Returns (B, S, d_model) float32 = table[x] * sqrt(d_model).
    """
    B, S = x.shape
    vocab, d_model = embedding_table.shape
    N = B * S
    scale = math.sqrt(d_model)

    T = tile_tokens if tile_tokens is not None else _choose_tile_tokens(N, vocab, d_model)
    N_pad = _round_up(N, T)

    # Flatten + pad token ids; store them as a (N_pad, 1) column so the kernel
    # sees a sublane-aligned (T, 1) int32 block (last dim == full array dim).
    ids = x.reshape(N).astype(jnp.int32)
    ids_col = jnp.pad(ids, (0, N_pad - N)).reshape(N_pad, 1)

    # VMEM budget: resident table + double-buffered out/ids tiles + headroom.
    table_bytes = vocab * d_model * embedding_table.dtype.itemsize
    needed = table_bytes + 2 * (T * d_model * 4 + T * 4) + (4 << 20)
    vmem_limit = int(min(max(needed, 32 << 20), 56 << 20))  # stay safe on v7x (64 MiB VMEM)

    out_flat = pl.pallas_call(
        functools.partial(_embed_kernel, scale=scale),
        out_shape=jax.ShapeDtypeStruct((N_pad, d_model), jnp.float32),
        grid_spec=pltpu.PrefetchScalarGridSpec(
            num_scalar_prefetch=0,
            grid=(N_pad // T,),
            in_specs=[
                # Per-step token-id tile.
                pl.BlockSpec((T, 1), lambda i: (i, 0)),
                # Whole embedding table, resident across the grid (loaded once).
                pl.BlockSpec((vocab, d_model), lambda i: (0, 0)),
            ],
            out_specs=pl.BlockSpec((T, d_model), lambda i: (i, 0)),
        ),
        compiler_params=pltpu.CompilerParams(
            dimension_semantics=("parallel",),   # tokens independent -> 2 TCs on v7x
            vmem_limit_bytes=vmem_limit,
        ),
    )(ids_col, embedding_table)

    return out_flat[:N].reshape(B, S, d_model)


if __name__ == "__main__":
    # Small shapes consistent with the module: batch=2, seq=8, vocab=64, d_model=128.
    d_model = 128
    vocab_size = 64
    batch, seq = 2, 8

    key = jax.random.PRNGKey(0)
    k_emb, k_ids = jax.random.split(key)

    # nn.Embedding default init: N(0, 1) weights of shape (vocab_size, d_model).
    embedding_table = jax.random.normal(k_emb, (vocab_size, d_model), dtype=jnp.float32)
    x = jax.random.randint(k_ids, (batch, seq), 0, vocab_size, dtype=jnp.int32)

    out = input_embeddings(x, embedding_table)
    out = jax.block_until_ready(out)

    # Reference check (plain JAX).
    ref = jnp.take(embedding_table, x, axis=0) * math.sqrt(d_model)
    assert out.shape == (batch, seq, d_model)
    assert jnp.allclose(out, ref, atol=1e-5, rtol=1e-5)

    print("KERNEL_OK")
</pallas_src>

<mosaic_0001>
module attributes {stable_mosaic.version = 11 : i64} {
  func.func @_embed_kernel(%arg0: i32, %arg1: memref<16x1xi32, #tpu.memory_space<vmem>>, %arg2: memref<64x128xf32, #tpu.memory_space<vmem>>, %arg3: memref<16x128xf32, #tpu.memory_space<vmem>>) attributes {dimension_semantics = [#tpu.dimension_semantics<parallel>], iteration_bounds = array<i64: 1>, scalar_prefetch = 0 : i64, scratch_operands = 0 : i64, tpu.core_type = #tpu.core_type<tc>, window_params = [{transform_indices = @transform_0, window_bounds = array<i64: 16, 1>}, {pipeline_mode = #tpu.pipeline_mode<synchronous>, transform_indices = @transform_1, window_bounds = array<i64: 64, 128>}, {transform_indices = @transform_2, window_bounds = array<i64: 16, 128>}]} {
    %c0 = arith.constant 0 : index
    %c0_0 = arith.constant 0 : index
    %0 = vector.load %arg1[%c0, %c0_0] : memref<16x1xi32, #tpu.memory_space<vmem>>, vector<16x1xi32>
    %1 = tpu.iota {dimensions = array<i32: 1>} : vector<16x64xi32>
    %2 = vector.broadcast %0 : vector<16x1xi32> to vector<16x64xi32>
    %3 = arith.cmpi eq, %2, %1 : vector<16x64xi32>
    %cst = arith.constant 1.000000e+00 : f32
    %cst_1 = arith.constant 0.000000e+00 : f32
    %4 = vector.broadcast %cst : f32 to vector<16x64xf32>
    %5 = vector.broadcast %cst_1 : f32 to vector<16x64xf32>
    %6 = arith.select %3, %4, %5 : vector<16x64xi1>, vector<16x64xf32>
    %c0_2 = arith.constant 0 : index
    %c0_3 = arith.constant 0 : index
    %7 = vector.load %arg2[%c0_2, %c0_3] : memref<64x128xf32, #tpu.memory_space<vmem>>, vector<64x128xf32>
    %cst_4 = arith.constant dense<0.000000e+00> : vector<16x128xf32>
    %8 = tpu.matmul %6, %7, %cst_4 {dimension_numbers = #tpu.dot_dimension_numbers<[1], [0], [0], [1], [0, 0, 1, 1], [], []>, precision = #tpu.contract_precision<fp32>} : vector<16x64xf32>, vector<64x128xf32>, vector<16x128xf32> -> vector<16x128xf32>
    %cst_5 = arith.constant 11.3137083 : f32
    %9 = vector.broadcast %cst_5 : f32 to vector<16x128xf32>
    %10 = arith.mulf %8, %9 : vector<16x128xf32>
    %c0_6 = arith.constant 0 : index
    %c0_7 = arith.constant 0 : index
    %11 = vector.load %arg3[%c0_6, %c0_7] : memref<16x128xf32, #tpu.memory_space<vmem>>, vector<16x128xf32>
    tpu.vector_store %arg3[%c0_6, %c0_7], %10 {strides = array<i32>} : memref<16x128xf32, #tpu.memory_space<vmem>>, vector<16x128xf32>,
    return
  }
  func.func @transform_0(%arg0: i32) -> (i32, i32) {
    %c0_i32 = arith.constant 0 : i32
    %c0_i32_0 = arith.constant 0 : i32
    return %arg0, %c0_i32 : i32, i32
  }
  func.func @transform_1(%arg0: i32) -> (i32, i32) {
    %c0_i32 = arith.constant 0 : i32
    %c0_i32_0 = arith.constant 0 : i32
    %c0_i32_1 = arith.constant 0 : i32
    return %c0_i32, %c0_i32_0 : i32, i32
  }
  func.func @transform_2(%arg0: i32) -> (i32, i32) {
    %c0_i32 = arith.constant 0 : i32
    %c0_i32_0 = arith.constant 0 : i32
    return %arg0, %c0_i32 : i32, i32
  }
}

</mosaic_0001>

<bundles_post_ra>
// kernel: tpu_custom_call.1
= control target key start
LH: loop header
LB: loop body
LE: loop exit
PB: predicated region body
PF: predicated region fallthrough
CT: control target
= control target key end

     0   :  { %7 = vsyncpa [#allocation3], 0  ;;  %s535_s0 = inlined_call_operand.vmem [shape: s32[16,1], index: 0, kind: input, shape index: {}]   ;;  %s536_s1 = inlined_call_operand.hbm [shape: f32[64,128], index: 1, kind: input, shape index: {}]   ;;  %s537_s2 = inlined_call_operand.hbm [shape: f32[16,128], index: 2, kind: output, shape index: {}]  }
   0x1   :  { %8 = vsyncpa [#allocation4], 0  ;;  %s15_s11 = sshll.u32 %s536_s1, 4  ;;  %s429_s12 = smov [#allocation2]   ;;  %s16_s11 = int_to_ptr.hbm [resolvable:$true] %s15_s11 }
   0x2   :  { %s17_s13 = sshll.u32 %s429_s12, 4  ;;  %s430_s14 = smov 128   ;;  %s18_s13 = int_to_ptr.vmem [resolvable:$true] %s17_s13 }
   0x3   :  { %s431_s15 = smov 8  }
   0x4   :  { %23 = dma.hbm_to_vmem [thread:$0]  %s16_s11, 1024, %s18_s13, [#allocation3], %s430_s14, %s430_s14, %s431_s15  }
   0x5   :  { %425 = dma.done.wait [#allocation3], 1024  }
   0x6   :  { %426 = vsyncadd [#allocation3], 4294966272  ;;  %v432_v0 = vmov 0   ;;  %v28_v1 = vld [vmem:[%s535_s0] sm:$0xff]  ;;  %v49_v2 = vld [vmem:[#allocation2 + $0x38] sm:$0xff]  ;;  %v30_v51 = vlaneseq  ;;  %vm50_vm0 = vcmask 523264  }
   0x7   :  { %376 = vset.pattern.permute.xlu0 %v432_v0  ;;  %v459_v3 = vand.u32 4294901760, %v49_v2  ;;  %v48_v4 = vld [vmem:[#allocation2 + $0x30] sm:$0xff]  ;;  %v47_v5 = vld [vmem:[#allocation2 + $0x28] sm:$0xff]  ;;  %v46_v6 = vld [vmem:[#allocation2 + $0x20] sm:$0xff]  ;;  %v433_v54 = vmov 0.0   ;;  %s335_s22 = sshll.u32 %s537_s2, 4  ;;  %s336_s22 = int_to_ptr.hbm [resolvable:$true] %s335_s22 }
   0x8   :  { %33 = vperm.xlu0 %376, %v28_v1   ;;  %v461_v7 = vand.u32 4294901760, %v48_v4  ;;  %v463_v8 = vand.u32 4294901760, %v47_v5  ;;  %v465_v9 = vand.u32 4294901760, %v46_v6  ;;  %v45_v10 = vld [vmem:[#allocation2 + $0x18] sm:$0xff]  ;;  %v44_v11 = vld [vmem:[#allocation2 + $0x10] sm:$0xff]  ;;  %v43_v12 = vld [vmem:[#allocation2 + $0x8] sm:$0xff] }
   0x9   :  { %v107_v13 = vsub.f32 %v49_v2, %v459_v3  ;;  %215 = vmatpush.msra.mxu3 %v459_v3  ;;  %v469_v14 = vand.u32 4294901760, %v45_v10  ;;  %66 = vmatpush.msra.mxu0 %v459_v3  ;;  %v472_v15 = vand.u32 4294901760, %v44_v11  ;;  %v474_v16 = vand.u32 4294901760, %v43_v12  ;;  %v29_v23 = vld [vmem:[%s535_s0 + $0x8] sm:$0xff]  ;;  %v42_v45 = vld [vmem:[#allocation2] sm:$0xff]  ;;  %s434_s0 = smov [#allocation5]  }
   0xa   :  { %v113_v17 = vsub.f32 %v48_v4, %v461_v7  ;;  %v119_v18 = vsub.f32 %v47_v5, %v463_v8  ;;  %v125_v19 = vsub.f32 %v46_v6, %v465_v9  ;;  %v79_v46 = vand.u32 4294901760, %v42_v45  ;;  %s333_s19 = sshll.u32 %s434_s0, 4  ;;  %s334_s19 = int_to_ptr.vmem [resolvable:$true] %s333_s19 }
   0xb   :  { %v108_v20 = vand.u32 4294901760, %v107_v13  ;;  %173 = vmatpush.msra.mxu2 %v107_v13  ;;  %217 = vmatpush.msra.mxu3 %v461_v7  ;;  %v131_v21 = vsub.f32 %v45_v10, %v469_v14  ;;  %v137_v22 = vsub.f32 %v44_v11, %v472_v15  ;;  %v143_v29 = vsub.f32 %v43_v12, %v474_v16 }
   0xc   :  { %v114_v24 = vand.u32 4294901760, %v113_v17  ;;  %v120_v25 = vand.u32 4294901760, %v119_v18  ;;  %v485_v26 = vand.u32 4294901760, %v125_v19  ;;  %68 = vmatpush.msra.mxu0 %v461_v7  ;;  %v149_v47 = vsub.f32 %v42_v45, %v79_v46 }
   0xd   :  { %v109_v27 = vsub.f32 %v107_v13, %v108_v20  ;;  %176 = vmatpush.msra.mxu2 %v113_v17  ;;  %v488_v28 = vand.u32 4294901760, %v131_v21  ;;  %219 = vmatpush.msra.mxu3 %v463_v8  ;;  %v138_v34 = vand.u32 4294901760, %v137_v22  ;;  %v144_v38 = vand.u32 4294901760, %v143_v29 }
   0xe   :  { %v115_v30 = vsub.f32 %v113_v17, %v114_v24  ;;  %v121_v31 = vsub.f32 %v119_v18, %v120_v25  ;;  %70 = vmatpush.msra.mxu0 %v463_v8  ;;  %v127_v33 = vsub.f32 %v125_v19, %v485_v26  ;;  %v150_v48 = vand.u32 4294901760, %v149_v47 }
   0xf   :  { %v110_v32 = vand.u32 4294901760, %v109_v27  ;;  %179 = vmatpush.msra.mxu2 %v119_v18  ;;  %221 = vmatpush.msra.mxu3 %v465_v9  ;;  %v133_v37 = vsub.f32 %v131_v21, %v488_v28  ;;  %v139_v40 = vsub.f32 %v137_v22, %v138_v34  ;;  %v145_v42 = vsub.f32 %v143_v29, %v144_v38 }
  0x10   :  { %36 = vperm.xlu0 %376, %v29_v23   ;;  %v116_v35 = vand.u32 4294901760, %v115_v30  ;;  %72 = vmatpush.msra.mxu0 %v465_v9  ;;  %v122_v36 = vand.u32 4294901760, %v121_v31  ;;  %v128_v39 = vand.u32 4294901760, %v127_v33  ;;  %v151_v49 = vsub.f32 %v149_v47, %v150_v48 }
  0x11   :  { %111 = vmatpush.msra.mxu1 %v110_v32  ;;  %182 = vmatpush.msra.mxu2 %v125_v19  ;;  %v134_v41 = vand.u32 4294901760, %v133_v37  ;;  %v140_v43 = vand.u32 4294901760, %v139_v40  ;;  %v146_v44 = vand.u32 4294901760, %v145_v42  ;;  %v31_v52 = vand.u32 127, %v30_v51 }
  0x12   :  { %223 = vmatpush.msra.mxu3 %v469_v14  ;;  %74 = vmatpush.msra.mxu0 %v469_v14  ;;  %v152_v50 = vand.u32 4294901760, %v151_v49 }
  0x13   :  { %117 = vmatpush.msra.mxu1 %v116_v35  ;;  %185 = vmatpush.msra.mxu2 %v131_v21 }
  0x14   :  { %225 = vmatpush.msra.mxu3 %v472_v15  ;;  %76 = vmatpush.msra.mxu0 %v472_v15 }
  0x15   :  { %123 = vmatpush.msra.mxu1 %v122_v36  ;;  %188 = vmatpush.msra.mxu2 %v137_v22 }
  0x16   :  { %227 = vmatpush.msra.mxu3 %v474_v16  ;;  %78 = vmatpush.msra.mxu0 %v474_v16 }
  0x17   :  { %129 = vmatpush.msra.mxu1 %v128_v39  ;;  %191 = vmatpush.msra.mxu2 %v143_v29 }
  0x18   :  { %229 = vmatpush.msra.mxu3 %v79_v46  ;;  %80 = vmatpush.msra.mxu0 %v79_v46 }
  0x19   :  { %135 = vmatpush.msra.mxu1 %v134_v41  ;;  %194 = vmatpush.msra.mxu2 %v149_v47 }
  0x1a   :  { %362 = vmatpush.msrb.mxu3 %v459_v3  ;;  %254 = vmatpush.msrb.mxu0 %v108_v20 }
  0x1b   :  { %141 = vmatpush.msra.mxu1 %v140_v43  ;;  %354 = vmatpush.msrb.mxu2 %v108_v20 }
  0x1c   :  { %363 = vmatpush.msrb.mxu3 %v461_v7  ;;  %258 = vmatpush.msrb.mxu0 %v114_v24 }
  0x1d   :  { %147 = vmatpush.msra.mxu1 %v146_v44  ;;  %355 = vmatpush.msrb.mxu2 %v114_v24 }
  0x1e   :  { %364 = vmatpush.msrb.mxu3 %v463_v8  ;;  %262 = vmatpush.msrb.mxu0 %v120_v25 }
  0x1f   :  { %356 = vmatpush.msrb.mxu2 %v120_v25  ;;  %153 = vmatpush.msra.mxu1 %v152_v50 }
  0x20   :  { %365 = vmatpush.msrb.mxu3 %v465_v9  ;;  %266 = vmatpush.msrb.mxu0 %v485_v26 }
  0x21   :  { %301 = vmatpush.msrb.mxu1 %v459_v3  ;;  %357 = vmatpush.msrb.mxu2 %v485_v26 }
  0x22   :  { %366 = vmatpush.msrb.mxu3 %v469_v14  ;;  %270 = vmatpush.msrb.mxu0 %v488_v28 }
  0x23   :  { %303 = vmatpush.msrb.mxu1 %v461_v7  ;;  %358 = vmatpush.msrb.mxu2 %v488_v28 }
  0x24   :  { %367 = vmatpush.msrb.mxu3 %v472_v15  ;;  %274 = vmatpush.msrb.mxu0 %v138_v34 }
  0x25   :  { %305 = vmatpush.msrb.mxu1 %v463_v8  ;;  %359 = vmatpush.msrb.mxu2 %v138_v34 }
  0x26   :  { %368 = vmatpush.msrb.mxu3 %v474_v16  ;;  %278 = vmatpush.msrb.mxu0 %v144_v38 }
  0x27   :  { %307 = vmatpush.msrb.mxu1 %v465_v9  ;;  %360 = vmatpush.msrb.mxu2 %v144_v38 }
  0x28   :  { %369 = vmatpush.msrb.mxu3 %v79_v46  ;;  %282 = vmatpush.msrb.mxu0 %v150_v48 }
  0x29   :  { %309 = vmatpush.msrb.mxu1 %v469_v14  ;;  %361 = vmatpush.msrb.mxu2 %v150_v48 }
  0x2b   :  { %311 = vmatpush.msrb.mxu1 %v472_v15 }
  0x2d   :  { %313 = vmatpush.msrb.mxu1 %v474_v16 }
  0x2f   :  { %315 = vmatpush.msrb.mxu1 %v79_v46 }
  0x7a   :  { %v34_v53 = vpop.permute.xlu0 %33 }
  0x7b   :  { %vm38_vm1 = vcmp.eq.s32.totalorder %v34_v53, %v31_v52 }
  0x7c   :  { %v40_v55 = vsel %vm38_vm1, 1.0, %v433_v54 }
  0x7d   :  { %348 = vmatmul.msk.f32.vlgmr.msra.gmra.mxu1 %vm50_vm0, %v40_v55  ;;  %v52_v56 = vsel %vm50_vm0, %v40_v55, 0 }
  0x7e   :  { %v82_v57 = vsub.f32 %v52_v56, %v52_v56 }
  0x80   :  { %197 = vmatmul.f32.vlgmr.msra.gmra.mxu2 %v82_v57  ;;  %v83_v58 = vand.u32 4294901760, %v82_v57 }
  0x82   :  { %233 = vmatmul.f32.vlgmr.msra.gmra.mxu3 %v83_v58  ;;  %v37_v59 = vpop.permute.xlu0 %36  ;;  %v84_v60 = vsub.f32 %v82_v57, %v83_v58 }
  0x83   :  { %vm39_vm2 = vcmp.eq.s32.totalorder %v37_v59, %v31_v52 }
  0x84   :  { %v41_v61 = vsel %vm39_vm2, 1.0, %v433_v54  ;;  %v85_v62 = vand.u32 4294901760, %v84_v60 }
  0x85   :  { %349 = vmatmul.msk.f32.gmra.mxu1 %vm50_vm0, %v41_v61  ;;  %v55_v63 = vsel %vm50_vm0, %v41_v61, 0 }
  0x86   :  { %86 = vmatmul.f32.vlgmr.msra.gmra.mxu0 %v85_v62  ;;  %v90_v0 = vsub.f32 %v55_v63, %v55_v63 }
  0x88   :  { %202 = vmatmul.f32.gmra.mxu2 %v90_v0  ;;  %v91_v1 = vand.u32 4294901760, %v90_v0 }
  0x8a   :  { %239 = vmatmul.f32.gmra.mxu3 %v91_v1  ;;  %v92_v2 = vsub.f32 %v90_v0, %v91_v1 }
  0x8c   :  { %v93_v3 = vand.u32 4294901760, %v92_v2 }
  0x8d   :  { %352 = vmatmul.msk.f32.vlgmr.msrb.gmra.mxu1 %vm50_vm0, %v40_v55 }
  0x8e   :  { %94 = vmatmul.f32.gmra.mxu0 %v93_v3 }
  0x90   :  { %351 = vmatmul.msk.f32.vlgmr.msrb.gmra.mxu2 %vm50_vm0, %v41_v61 }
  0x92   :  { %353 = vmatmul.msk.f32.vlgmr.msrb.gmra.mxu3 %vm50_vm0, %v41_v61 }
  0x96   :  { %350 = vmatmul.msk.f32.vlgmr.msrb.gmra.mxu0 %vm50_vm0, %v40_v55 }
  0xfa   :  { %v156_v4 = vpop.f32.mrf.mxu1 }
 0x102   :  { %v160_v8 = vpop.f32.mrf.mxu1 }
 0x103   :  { %v87_v5 = vpop.f32.mrf.mxu0  ;;  %v198_v6 = vpop.f32.mrf.mxu2 }
 0x104   :  { %v157_v9 = vadd.f32 %v156_v4, %v87_v5 }
 0x105   :  { %v234_v7 = vpop.f32.mrf.mxu3 }
 0x106   :  { %v199_v14 = vadd.f32 %v198_v6, %v157_v9 }
 0x108   :  { %v235_v16 = vadd.f32 %v234_v7, %v199_v14 }
 0x10a   :  { %v318_v22 = vpop.f32.mrf.mxu1 }
 0x10b   :  { %v95_v10 = vpop.f32.mrf.mxu0  ;;  %v203_v11 = vpop.f32.mrf.mxu2 }
 0x10c   :  { %v161_v12 = vadd.f32 %v160_v8, %v95_v10 }
 0x10d   :  { %v240_v13 = vpop.f32.mrf.mxu3 }
 0x10e   :  { %v204_v15 = vadd.f32 %v203_v11, %v161_v12 }
 0x110   :  { %v241_v17 = vadd.f32 %v240_v13, %v204_v15 }
 0x113   :  { %v285_v18 = vpop.f32.mrf.mxu0  ;;  %v289_v19 = vpop.f32.mrf.mxu2 }
 0x114   :  { %v286_v20 = vadd.f32 %v285_v18, %v235_v16  ;;  %v290_v21 = vadd.f32 %v289_v19, %v241_v17 }
 0x115   :  { %v322_v23 = vpop.f32.mrf.mxu3 }
 0x116   :  { %v319_v24 = vadd.f32 %v318_v22, %v286_v20  ;;  %v323_v25 = vadd.f32 %v322_v23, %v290_v21 }
 0x118   :  { %v325_v26 = vmul.f32 11.313708, %v319_v24  ;;  %v326_v27 = vmul.f32 11.313708, %v323_v25 }
 0x11a   :  { %327 = vst [vmem:[#allocation5] sm:$0xff] %v325_v26 }
 0x11b   :  { %328 = vst [vmem:[#allocation5 + $0x8] sm:$0xff] %v326_v27 }
 0x11c   :  { %341 = dma.vmem_to_hbm [thread:$0]  %s334_s19, 256, %s336_s22, [#allocation4], %s430_s14, %s430_s14, %s431_s15  }
 0x11d   :  { %427 = dma.done.wait [#allocation4], 256  }
 0x11e   :  { %428 = vsyncadd [#allocation4], 4294967040 }
 0x11f   :  { %346 = vsyncpa [#allocation3], 1 }
 0x120   :  { %347 = vsyncpa [#allocation4], 1 }

</bundles_post_ra>
